<compile_context>
chip_gen: v5e
topology: v5e:2x2
jax: 0.10.0
libtpu: 0.0.40
codegen_flags: <defaults>
</compile_context>

<pallas_src>
import functools

import jax
import jax.numpy as jnp
from jax.experimental import pallas as pl
from jax.experimental.pallas import tpu as pltpu


def _smooth_l1_kernel(x_ref, y_ref, *rest, tb, s_per_core, n_rows, acc_rows,
                      fuse_pool, w):
    """One (tb, cols) row block of SmoothL1 (beta=1) reduced over rows into a
    VMEM-resident (1, acc_rows, cols) lane accumulator.

    fuse_pool: y_ref holds the un-pooled target viewed as (tb, 4*w); columns
    [0:2w] / [2w:4w] are the two source rows of every 2x2 pool window, so the
    pool is done in-kernel (VPU add + one MXU matmul) and y is read from HBM
    exactly once.
    """
    if fuse_pool:
        pool_ref, out_ref = rest
    else:
        (out_ref,) = rest

    p = pl.program_id(0)          # core axis (size 1 on single-TC chips)
    i = pl.program_id(1)          # sequential accumulation axis

    @pl.when(i == 0)
    def _():
        out_ref[...] = jnp.zeros_like(out_ref)

    g = p * s_per_core + i        # unclamped global row-block index

    xv = x_ref[...].astype(jnp.float32)                  # (tb, cols)
    if fuse_pool:
        # 2x2 average pool: H-pair via lane-half add (VPU), W-pair via MXU
        # matmul with a (2w, w) matrix holding 0.25 at [2j, j] and [2j+1, j].
        y_top = y_ref[:, : 2 * w].astype(jnp.float32)    # (tb, 2w)
        y_bot = y_ref[:, 2 * w:].astype(jnp.float32)     # (tb, 2w)
        yv = jnp.dot(y_top + y_bot, pool_ref[...],
                     preferred_element_type=jnp.float32,
                     precision=jax.lax.Precision.HIGHEST)  # (tb, w)
    else:
        yv = y_ref[...].astype(jnp.float32)              # (tb, cols)

    d = xv - yv
    ad = jnp.abs(d)
    elem = jnp.where(ad < 1.0, 0.5 * d * d, ad - 0.5)    # SmoothL1, beta = 1

    def _reduce(e):
        # rows -> (acc_rows, cols): pure VPU slab adds when acc_rows == 8
        # (no cross-sublane XLU reduce); the tiny final reduce runs outside.
        if acc_rows == 8:
            return jnp.sum(e.reshape(tb // 8, 8, e.shape[-1]), axis=0)
        return jnp.sum(e, axis=0, keepdims=True)

    row0 = g * tb

    # Fast path: full block, no mask work at all (the common case).
    @pl.when(row0 + tb <= n_rows)
    def _():
        out_ref[...] += _reduce(elem)[None]

    # Tail / clamped-duplicate block: select (NOT multiply — the padded OOB
    # region may hold garbage/NaN) away rows past the logical end.
    @pl.when(row0 + tb > n_rows)
    def _():
        row = row0 + jax.lax.broadcasted_iota(jnp.int32, (tb, 1), 0)
        out_ref[...] += _reduce(jnp.where(row < n_rows, elem, 0.0))[None]


def _chip_config():
    """Generation-aware block budget / VMEM limit / core sharding."""
    try:
        kind = jax.devices()[0].device_kind.lower()
    except Exception:
        kind = ""
    if "v7" in kind or "7x" in kind:
        # v7x: 64 MiB VMEM per TC, 2 TensorCores -> shard the leading grid
        # axis with CORE_PARALLEL (plain "parallel" does not shard it there).
        return {
            "two_core": True,
            "budget": 28 << 20,       # double-buffered input bytes per step
            "vmem_limit": 40 << 20,
            "core_sem": getattr(pltpu, "CORE_PARALLEL", "parallel"),
            "arb_sem": getattr(pltpu, "ARBITRARY", "arbitrary"),
        }
    # v5e / v6e (and unknown): single TensorCore, 128 MiB physical VMEM.
    return {
        "two_core": False,
        "budget": 48 << 20,
        "vmem_limit": 80 << 20,
        "core_sem": "arbitrary",
        "arb_sem": "arbitrary",
    }


def _choose_cols(shape):
    """Copy-free 2D factorization (rows, cols) of an NCHW tensor.  Prefer a
    minor dim that is a multiple of 512 (then 128) for dense vregs and
    unmasked stores, falling back to the smallest lane-dense candidate."""
    n, c, h, w = shape
    cands = [w, h * w, c * h * w, n * c * h * w]
    limit = 1 << 17
    for align in (512, 128):
        good = [v for v in cands if v % align == 0 and 256 <= v <= limit]
        if good:
            return good[0]
    good = [v for v in cands if 256 <= v <= limit]
    if good:
        return good[0]
    small = [v for v in cands if v <= limit]
    return small[-1] if small else cands[0]


def _pick_tb(rows, cols, x_item, y_factor, y_item, budget, pool_bytes):
    """Largest row block keeping 2x double-buffered inputs under the budget."""
    per_row = 2 * cols * (x_item + y_factor * y_item)
    avail = max(budget - 2 * pool_bytes, per_row)
    gran = 8 if min(x_item, y_item) >= 4 else 16   # bf16 needs (16,128) tiles
    if rows <= gran:
        return rows
    tb = min(avail // per_row, rows)
    return max(gran, (tb // gran) * gran)


def l1_smooth_loss(x, y):
    """Equivalent of L1smooth.forward(x, y) for NCHW inputs."""
    n, c, h, w = x.shape
    _, _, yh, yw = y.shape
    cfg = _chip_config()

    fuse_pool = False
    if (yh, yw) != (h, w):
        # nn.Upsample(scale_factor=0.5, mode='bilinear', align_corners=False)
        # samples source coordinate 2*i + 0.5 -> exactly a 2x2 average pool.
        assert yh == 2 * h and yw == 2 * w, (
            "only the 0.5x bilinear downsample path is supported")
        if w % 128 == 0 and 128 <= w <= 1024:
            fuse_pool = True          # pool fused into the kernel: y read once
        else:
            # TODO(synk): fuse the 2x2 pool for lane-unfriendly widths too; for
            # now fall back to one fused XLA pooling pass (computed in f32).
            y = (y.astype(jnp.float32)
                  .reshape(n, c, h, 2, w, 2).mean(axis=(3, 5)))

    total = n * c * h * w
    if fuse_pool:
        cols = w
        y_factor = 4
        rows = total // cols
        y2 = y.reshape(rows, 4 * w)   # x row r <-> its two 2w-wide source rows
    else:
        cols = _choose_cols(x.shape)
        y_factor = 1
        rows = total // cols
        y2 = y.reshape(rows, cols)    # contiguous reshape: no HBM copy
    x2 = x.reshape(rows, cols)        # contiguous reshape: no HBM copy

    args = [x2, y2]
    pool_bytes = 0
    if fuse_pool:
        r_idx = jnp.arange(2 * w, dtype=jnp.int32)[:, None]
        c_idx = jnp.arange(w, dtype=jnp.int32)[None, :]
        pool = jnp.where(r_idx // 2 == c_idx, 0.25, 0.0).astype(jnp.float32)
        args.append(pool)
        pool_bytes = 2 * w * w * 4

    tb = _pick_tb(rows, cols, x.dtype.itemsize, y_factor, y2.dtype.itemsize,
                  cfg["budget"], pool_bytes)
    n_blocks = pl.cdiv(rows, tb)
    n_cores = 2 if (cfg["two_core"] and n_blocks >= 2) else 1
    s_per_core = pl.cdiv(n_blocks, n_cores)
    acc_rows = 8 if tb % 8 == 0 else 1

    def in_map(p, i):
        # Clamp so duplicated tail steps (odd n_blocks on the 2-core path)
        # still point at a valid block; their contribution is masked to zero.
        return (jnp.minimum(p * s_per_core + i, n_blocks - 1), 0)

    in_specs = [pl.BlockSpec((tb, cols), in_map),
                pl.BlockSpec((tb, cols * y_factor), in_map)]
    if fuse_pool:
        # Constant block index -> the pool matrix is DMA'd once and reused.
        in_specs.append(pl.BlockSpec((2 * w, w), lambda p, i: (0, 0)))

    kernel = functools.partial(
        _smooth_l1_kernel, tb=tb, s_per_core=s_per_core, n_rows=rows,
        acc_rows=acc_rows, fuse_pool=fuse_pool, w=cols)

    flops = 7 * total
    if fuse_pool:
        flops += 2 * rows * (2 * w) * w          # in-kernel pooling matmul
    bytes_accessed = (x2.size * x2.dtype.itemsize
                      + y2.size * y2.dtype.itemsize
                      + pool_bytes + n_cores * acc_rows * cols * 4)

    if n_cores == 2:
        dim_sem = (cfg["core_sem"], cfg["arb_sem"])
    else:
        dim_sem = ("arbitrary", "arbitrary")

    partials = pl.pallas_call(
        kernel,
        out_shape=jax.ShapeDtypeStruct((n_cores, acc_rows, cols), jnp.float32),
        grid_spec=pltpu.PrefetchScalarGridSpec(
            num_scalar_prefetch=0,
            grid=(n_cores, s_per_core),
            in_specs=in_specs,
            out_specs=pl.BlockSpec((1, acc_rows, cols), lambda p, i: (p, 0, 0)),
        ),
        compiler_params=pltpu.CompilerParams(
            dimension_semantics=dim_sem,
            vmem_limit_bytes=cfg["vmem_limit"],
        ),
        cost_estimate=pl.CostEstimate(
            flops=int(flops), transcendentals=0,
            bytes_accessed=int(bytes_accessed)),
    )(*args)

    # Tiny final cross-lane/sublane reduction + mean normalization outside.
    return jnp.sum(partials) * (1.0 / total)


def _ref_loss(x, y):
    """Pure-JAX reference of the PyTorch module (math in f32)."""
    x = x.astype(jnp.float32)
    y = y.astype(jnp.float32)
    n, c, h, w = x.shape
    if y.shape[2] != h:
        y = y.reshape(n, c, h, 2, w, 2).mean(axis=(3, 5))
    d = x - y
    ad = jnp.abs(d)
    return jnp.mean(jnp.where(ad < 1.0, 0.5 * d * d, ad - 0.5))


if __name__ == "__main__":
    key = jax.random.PRNGKey(0)
    k1, k2, k3, k4, k5, k6, k7, k8 = jax.random.split(key, 8)

    # 1) Matching spatial sizes -> plain SmoothL1.
    x1 = jax.random.normal(k1, (2, 4, 16, 16), jnp.float32)
    y1 = jax.random.normal(k2, (2, 4, 16, 16), jnp.float32)

    # 2) Downsample branch, lane-friendly width -> fused in-kernel 2x2 pool.
    x2 = jax.random.normal(k3, (2, 4, 8, 128), jnp.float32)
    y2 = jax.random.normal(k4, (2, 4, 16, 256), jnp.float32)

    # 3) Downsample branch, lane-unfriendly width -> XLA pool fallback.
    x3 = jax.random.normal(k5, (2, 4, 8, 8), jnp.float32)
    y3 = jax.random.normal(k6, (2, 4, 16, 16), jnp.float32)

    # 4) Awkward row count -> multi-step accumulation + masked tail block.
    x4 = jax.random.normal(k7, (3, 5, 7, 256), jnp.float32)
    y4 = jax.random.normal(k8, (3, 5, 7, 256), jnp.float32)

    # 5) bf16 inputs fed directly to the kernel (upcast happens in VMEM).
    x5 = jax.random.normal(k1, (4, 4, 16, 32), jnp.float32).astype(jnp.bfloat16)
    y5 = jax.random.normal(k2, (4, 4, 16, 32), jnp.float32).astype(jnp.bfloat16)

    cases = [(x1, y1), (x2, y2), (x3, y3), (x4, y4), (x5, y5)]
    for xc, yc in cases:
        out = jax.block_until_ready(l1_smooth_loss(xc, yc))
        ref = _ref_loss(xc, yc)
        assert jnp.allclose(out, ref, atol=1e-5, rtol=1e-5), (xc.shape, out, ref)

    print("KERNEL_OK")
</pallas_src>

<mosaic_0001>
module attributes {stable_mosaic.version = 11 : i64} {
  func.func @_smooth_l1_kernel(%arg0: i32, %arg1: i32, %arg2: memref<2x1024xf32, #tpu.memory_space<vmem>>, %arg3: memref<2x1024xf32, #tpu.memory_space<vmem>>, %arg4: memref<1x1x1024xf32, #tpu.memory_space<vmem>>) attributes {dimension_semantics = [#tpu.dimension_semantics<arbitrary>, #tpu.dimension_semantics<arbitrary>], iteration_bounds = array<i64: 1, 1>, scalar_prefetch = 0 : i64, scratch_operands = 0 : i64, tpu.core_type = #tpu.core_type<tc>, window_params = [{transform_indices = @transform_0, window_bounds = array<i64: 2, 1024>}, {transform_indices = @transform_1, window_bounds = array<i64: 2, 1024>}, {transform_indices = @transform_2, window_bounds = array<i64: 1, 1, 1024>}]} {
    %c0_i32 = arith.constant 0 : i32
    %0 = arith.cmpi eq, %arg1, %c0_i32 : i32
    %1 = arith.extui %0 : i1 to i32
    %c0_i32_0 = arith.constant 0 : i32
    %2 = arith.cmpi ne, %1, %c0_i32_0 : i32
    scf.if %2 {
      %cst_12 = arith.constant 0.000000e+00 : f32
      %26 = vector.broadcast %cst_12 : f32 to vector<1x1x1024xf32>
      %c0_13 = arith.constant 0 : index
      %c0_14 = arith.constant 0 : index
      %c0_15 = arith.constant 0 : index
      %27 = vector.load %arg4[%c0_13, %c0_14, %c0_15] : memref<1x1x1024xf32, #tpu.memory_space<vmem>>, vector<1x1x1024xf32>
      tpu.vector_store %arg4[%c0_13, %c0_14, %c0_15], %26 {strides = array<i32>} : memref<1x1x1024xf32, #tpu.memory_space<vmem>>, vector<1x1x1024xf32>,
    } else {
    }
    %c1_i32 = arith.constant 1 : i32
    %3 = arith.muli %arg0, %c1_i32 : i32
    %4 = arith.addi %3, %arg1 : i32
    %c0 = arith.constant 0 : index
    %c0_1 = arith.constant 0 : index
    %5 = vector.load %arg2[%c0, %c0_1] : memref<2x1024xf32, #tpu.memory_space<vmem>>, vector<2x1024xf32>
    %c0_2 = arith.constant 0 : index
    %c0_3 = arith.constant 0 : index
    %6 = vector.load %arg3[%c0_2, %c0_3] : memref<2x1024xf32, #tpu.memory_space<vmem>>, vector<2x1024xf32>
    %7 = arith.subf %5, %6 : vector<2x1024xf32>
    %8 = math.absf %7 : vector<2x1024xf32>
    %cst = arith.constant 1.000000e+00 : f32
    %9 = vector.broadcast %cst : f32 to vector<2x1024xf32>
    %10 = arith.cmpf olt, %8, %9 : vector<2x1024xf32>
    %cst_4 = arith.constant 5.000000e-01 : f32
    %11 = vector.broadcast %cst_4 : f32 to vector<2x1024xf32>
    %12 = arith.mulf %11, %7 : vector<2x1024xf32>
    %13 = arith.mulf %12, %7 : vector<2x1024xf32>
    %cst_5 = arith.constant 5.000000e-01 : f32
    %14 = vector.broadcast %cst_5 : f32 to vector<2x1024xf32>
    %15 = arith.subf %8, %14 : vector<2x1024xf32>
    %16 = arith.select %10, %13, %15 : vector<2x1024xi1>, vector<2x1024xf32>
    %c2_i32 = arith.constant 2 : i32
    %17 = arith.muli %4, %c2_i32 : i32
    %c2_i32_6 = arith.constant 2 : i32
    %18 = arith.addi %17, %c2_i32_6 : i32
    %c2_i32_7 = arith.constant 2 : i32
    %19 = arith.cmpi sle, %18, %c2_i32_7 : i32
    %20 = arith.extui %19 : i1 to i32
    %c0_i32_8 = arith.constant 0 : i32
    %21 = arith.cmpi ne, %20, %c0_i32_8 : i32
    scf.if %21 {
      %c0_12 = arith.constant 0 : index
      %c0_13 = arith.constant 0 : index
      %c0_14 = arith.constant 0 : index
      %26 = vector.load %arg4[%c0_12, %c0_13, %c0_14] : memref<1x1x1024xf32, #tpu.memory_space<vmem>>, vector<1x1x1024xf32>
      %cst_15 = arith.constant dense<0.000000e+00> : vector<1024xf32>
      %27 = vector.multi_reduction <add>, %16, %cst_15 [0] : vector<2x1024xf32> to vector<1024xf32>
      %28 = vector.shape_cast %27 : vector<1024xf32> to vector<1x1024xf32>
      %29 = vector.shape_cast %28 : vector<1x1024xf32> to vector<1x1x1024xf32>
      %30 = arith.addf %26, %29 : vector<1x1x1024xf32>
      %c0_16 = arith.constant 0 : index
      %c0_17 = arith.constant 0 : index
      %c0_18 = arith.constant 0 : index
      %31 = vector.load %arg4[%c0_16, %c0_17, %c0_18] : memref<1x1x1024xf32, #tpu.memory_space<vmem>>, vector<1x1x1024xf32>
      tpu.vector_store %arg4[%c0_16, %c0_17, %c0_18], %30 {strides = array<i32>} : memref<1x1x1024xf32, #tpu.memory_space<vmem>>, vector<1x1x1024xf32>,
    } else {
    }
    %c2_i32_9 = arith.constant 2 : i32
    %22 = arith.addi %17, %c2_i32_9 : i32
    %c2_i32_10 = arith.constant 2 : i32
    %23 = arith.cmpi sgt, %22, %c2_i32_10 : i32
    %24 = arith.extui %23 : i1 to i32
    %c0_i32_11 = arith.constant 0 : i32
    %25 = arith.cmpi ne, %24, %c0_i32_11 : i32
    scf.if %25 {
      %26 = tpu.iota {dimensions = array<i32: 0>} : vector<2x1xi32>
      %27 = vector.broadcast %17 : i32 to vector<2x1xi32>
      %28 = arith.addi %27, %26 : vector<2x1xi32>
      %c0_12 = arith.constant 0 : index
      %c0_13 = arith.constant 0 : index
      %c0_14 = arith.constant 0 : index
      %29 = vector.load %arg4[%c0_12, %c0_13, %c0_14] : memref<1x1x1024xf32, #tpu.memory_space<vmem>>, vector<1x1x1024xf32>
      %c2_i32_15 = arith.constant 2 : i32
      %30 = vector.broadcast %c2_i32_15 : i32 to vector<2x1xi32>
      %31 = arith.cmpi slt, %28, %30 : vector<2x1xi32>
      %cst_16 = arith.constant 0.000000e+00 : f32
      %32 = vector.shape_cast %31 : vector<2x1xi1> to vector<2x1xi1>
      %33 = vector.broadcast %32 : vector<2x1xi1> to vector<2x1024xi1>
      %34 = vector.broadcast %cst_16 : f32 to vector<2x1024xf32>
      %35 = arith.select %33, %16, %34 : vector<2x1024xi1>, vector<2x1024xf32>
      %cst_17 = arith.constant dense<0.000000e+00> : vector<1024xf32>
      %36 = vector.multi_reduction <add>, %35, %cst_17 [0] : vector<2x1024xf32> to vector<1024xf32>
      %37 = vector.shape_cast %36 : vector<1024xf32> to vector<1x1024xf32>
      %38 = vector.shape_cast %37 : vector<1x1024xf32> to vector<1x1x1024xf32>
      %39 = arith.addf %29, %38 : vector<1x1x1024xf32>
      %c0_18 = arith.constant 0 : index
      %c0_19 = arith.constant 0 : index
      %c0_20 = arith.constant 0 : index
      %40 = vector.load %arg4[%c0_18, %c0_19, %c0_20] : memref<1x1x1024xf32, #tpu.memory_space<vmem>>, vector<1x1x1024xf32>
      tpu.vector_store %arg4[%c0_18, %c0_19, %c0_20], %39 {strides = array<i32>} : memref<1x1x1024xf32, #tpu.memory_space<vmem>>, vector<1x1x1024xf32>,
    } else {
    }
    return
  }
  func.func @transform_0(%arg0: i32, %arg1: i32) -> (i32, i32) {
    %c1_i32 = arith.constant 1 : i32
    %0 = arith.muli %arg0, %c1_i32 : i32
    %1 = arith.addi %0, %arg1 : i32
    %c0_i32 = arith.constant 0 : i32
    %2 = arith.minsi %1, %c0_i32 : i32
    %c0_i32_0 = arith.constant 0 : i32
    %c0_i32_1 = arith.constant 0 : i32
    return %2, %c0_i32_0 : i32, i32
  }
  func.func @transform_1(%arg0: i32, %arg1: i32) -> (i32, i32) {
    %c1_i32 = arith.constant 1 : i32
    %0 = arith.muli %arg0, %c1_i32 : i32
    %1 = arith.addi %0, %arg1 : i32
    %c0_i32 = arith.constant 0 : i32
    %2 = arith.minsi %1, %c0_i32 : i32
    %c0_i32_0 = arith.constant 0 : i32
    %c0_i32_1 = arith.constant 0 : i32
    return %2, %c0_i32_0 : i32, i32
  }
  func.func @transform_2(%arg0: i32, %arg1: i32) -> (i32, i32, i32) {
    %c0_i32 = arith.constant 0 : i32
    %c0_i32_0 = arith.constant 0 : i32
    %c0_i32_1 = arith.constant 0 : i32
    return %arg0, %c0_i32, %c0_i32_0 : i32, i32, i32
  }
}

</mosaic_0001>

<bundles_post_ra>
// kernel: tpu_custom_call.1
= control target key start
LH: loop header
LB: loop body
LE: loop exit
PB: predicated region body
PF: predicated region fallthrough
CT: control target
= control target key end

     0   :  { %7 = vsyncpa [#allocation3], 0  ;;  %s472_s0 = inlined_call_operand.hbm [shape: f32[2,1024], index: 0, kind: input, shape index: {}]   ;;  %s473_s1 = inlined_call_operand.hbm [shape: f32[2,1024], index: 1, kind: input, shape index: {}]   ;;  %s474_s2 = inlined_call_operand.hbm [shape: f32[1,1,1024], index: 2, kind: output, shape index: {}]  }
   0x1   :  { %8 = vsyncpa [#allocation6], 0 }
   0x2   :  { %9 = vsyncpa [#allocation4], 0  ;;  %s21_s11 = sshll.u32 %s472_s0, 4  ;;  %s433_s12 = smov [#allocation2]   ;;  %s22_s11 = int_to_ptr.hbm [resolvable:$true] %s21_s11 }
   0x3   :  { %s23_s13 = sshll.u32 %s433_s12, 4  ;;  %s38_s16 = sshll.u32 %s473_s1, 4  ;;  %s24_s13 = int_to_ptr.vmem [resolvable:$true] %s23_s13  ;;  %s39_s16 = int_to_ptr.hbm [resolvable:$true] %s38_s16 }
   0x4   :  { %26 = dma.hbm_to_vmem [thread:$0]  %s22_s11, 256, %s24_s13, [#allocation3]  }
   0x5   :  { %s434_s17 = smov [#allocation5]  }
   0x6   :  { %s40_s18 = sshll.u32 %s434_s17, 4  ;;  %s41_s18 = int_to_ptr.vmem [resolvable:$true] %s40_s18 }
   0x7   :  { %43 = dma.hbm_to_vmem [thread:$0]  %s39_s16, 256, %s41_s18, [#allocation6]  }
   0x8   :  { %427 = dma.done.wait [#allocation3], 256  }
   0x9   :  { %428 = vsyncadd [#allocation3], 4294967040 }
   0xa   :  { %429 = dma.done.wait [#allocation6], 256  }
   0xb   :  { %430 = vsyncadd [#allocation6], 4294967040  ;;  %v64_v0 = vld [vmem:[#allocation2] sm:$0xff]  ;;  %v66_v1 = vld [vmem:[#allocation5] sm:$0xff]  ;;  %vm110_vm2 = vcmask 1041408   ;;  %vm182_vm3 = vcmask 1040384  }
   0xc   :  { %v65_v2 = vld [vmem:[#allocation2 + $0x8] sm:$0xff]  ;;  %v68_v3 = vsub.f32 %v64_v0, %v66_v1  ;;  %v67_v4 = vld [vmem:[#allocation5 + $0x8] sm:$0xff]  ;;  %vm184_vm4 = vcmask 1042434   ;;  %vm187_vm5 = vcmask 1044484   ;;  %vm189_vm6 = vcmask 1046534   ;;  %s435_s0 = smov [#allocation7]  }
   0xd   :  { %v69_v5 = vsub.f32 %v65_v2, %v67_v4  ;;  %vm191_vm7 = vcmask 1045508   ;;  %vm193_vm8 = vcmask 1043456   ;;  %s332_s1 = sshll.u32 %s435_s0, 4  ;;  %s334_s21 = sshll.u32 %s474_s2, 4  ;;  %s333_s1 = int_to_ptr.vmem [resolvable:$true] %s332_s1  ;;  %s335_s21 = int_to_ptr.hbm [resolvable:$true] %s334_s21 }
   0xe   :  { %v70_v6 = vand.u32 2147483647, %v68_v3  ;;  %v74_v7 = vmul.f32 0.5, %v68_v3 }
   0xf   :  { %v71_v8 = vand.u32 2147483647, %v69_v5  ;;  %v75_v9 = vmul.f32 0.5, %v69_v5 }
  0x10   :  { %vm72_vm0 = vcmp.lt.f32.partialorder %v70_v6, 1.0  ;;  %v76_v10 = vmul.f32 %v74_v7, %v68_v3  ;;  %v349_v11 = vadd.f32 -0.5, %v70_v6 }
  0x11   :  { %vm73_vm1 = vcmp.lt.f32.partialorder %v71_v8, 1.0  ;;  %v77_v12 = vmul.f32 %v75_v9, %v69_v5  ;;  %v350_v13 = vadd.f32 -0.5, %v71_v8 }
  0x12   :  { %v80_v14 = vsel %vm72_vm0, %v76_v10, %v349_v11 }
  0x13   :  { %91 = vst [vmem:[#allocation1] ss:$4 sm:$0xff] %v80_v14  ;;  %v81_v15 = vsel %vm73_vm1, %v77_v12, %v350_v13 }
  0x14   :  { %93 = vst [vmem:[#allocation1 + $0x20] ss:$4 sm:$0xff] %v81_v15 }
  0x1a   :  { %v94_v16 = vld.sshfl [vmem:[#allocation1] sm:$0xff pattern:$0x73625140]  ;;  %v95_v17 = vld.sshfl [vmem:[#allocation1 + $0x8] sm:$0xff pattern:$0x73625140] }
  0x1b   :  { %v96_v18 = vld.sshfl [vmem:[#allocation1 + $0x10] sm:$0xff pattern:$0x73625140]  ;;  %v97_v19 = vld.sshfl [vmem:[#allocation1 + $0x18] sm:$0xff pattern:$0x73625140] }
  0x1c   :  { %v98_v20 = vld.sshfl [vmem:[#allocation1 + $0x20] sm:$0xff pattern:$0x73625140]  ;;  %v99_v21 = vld.sshfl [vmem:[#allocation1 + $0x28] sm:$0xff pattern:$0x73625140] }
  0x1d   :  { %v100_v22 = vld.sshfl [vmem:[#allocation1 + $0x30] sm:$0xff pattern:$0x73625140]  ;;  %v101_v23 = vld.sshfl [vmem:[#allocation1 + $0x38] sm:$0xff pattern:$0x73625140] }
  0x1e   :  { %v111_v24 = vsel %vm110_vm2, %v94_v16, 0.0  ;;  %v118_v25 = vsel %vm110_vm2, %v95_v17, 0.0  ;;  %v125_v26 = vsel %vm110_vm2, %v96_v18, 0.0  ;;  %v132_v27 = vsel %vm110_vm2, %v97_v19, 0.0 }
  0x1f   :  { %v112_v28 = vrot.slane %v111_v24, 4  ;;  %v119_v29 = vrot.slane %v118_v25, 4  ;;  %v126_v30 = vrot.slane %v125_v26, 4  ;;  %v133_v31 = vrot.slane %v132_v27, 4 }
  0x20   :  { %v139_v32 = vsel %vm110_vm2, %v98_v20, 0.0  ;;  %v146_v33 = vsel %vm110_vm2, %v99_v21, 0.0  ;;  %v153_v34 = vsel %vm110_vm2, %v100_v22, 0.0  ;;  %v160_v35 = vsel %vm110_vm2, %v101_v23, 0.0 }
  0x21   :  { %v113_v36 = vadd.f32 %v112_v28, %v111_v24  ;;  %v120_v37 = vadd.f32 %v119_v29, %v118_v25  ;;  %v127_v38 = vadd.f32 %v126_v30, %v125_v26  ;;  %v134_v39 = vadd.f32 %v133_v31, %v132_v27 }
  0x22   :  { %v140_v40 = vrot.slane %v139_v32, 4  ;;  %v147_v41 = vrot.slane %v146_v33, 4  ;;  %v154_v42 = vrot.slane %v153_v34, 4  ;;  %v161_v43 = vrot.slane %v160_v35, 4 }
  0x23   :  { %v114_v44 = vrot.slane %v113_v36, 2  ;;  %v121_v45 = vrot.slane %v120_v37, 2  ;;  %v128_v46 = vrot.slane %v127_v38, 2  ;;  %v135_v47 = vrot.slane %v134_v39, 2 }
  0x24   :  { %v141_v48 = vadd.f32 %v140_v40, %v139_v32  ;;  %v148_v49 = vadd.f32 %v147_v41, %v146_v33  ;;  %v155_v50 = vadd.f32 %v154_v42, %v153_v34  ;;  %v162_v51 = vadd.f32 %v161_v43, %v160_v35 }
  0x25   :  { %v115_v52 = vadd.f32 %v114_v44, %v113_v36  ;;  %v122_v53 = vadd.f32 %v121_v45, %v120_v37  ;;  %v129_v54 = vadd.f32 %v128_v46, %v127_v38  ;;  %v136_v55 = vadd.f32 %v135_v47, %v134_v39 }
  0x26   :  { %v142_v56 = vrot.slane %v141_v48, 2  ;;  %v149_v57 = vrot.slane %v148_v49, 2  ;;  %v156_v58 = vrot.slane %v155_v50, 2  ;;  %v163_v59 = vrot.slane %v162_v51, 2 }
  0x27   :  { %v116_v60 = vrot.slane %v115_v52, 1  ;;  %v123_v61 = vrot.slane %v122_v53, 1  ;;  %v130_v62 = vrot.slane %v129_v54, 1  ;;  %v137_v63 = vrot.slane %v136_v55, 1 }
  0x28   :  { %v143_v0 = vadd.f32 %v142_v56, %v141_v48  ;;  %v150_v1 = vadd.f32 %v149_v57, %v148_v49  ;;  %v157_v2 = vadd.f32 %v156_v58, %v155_v50  ;;  %v164_v3 = vadd.f32 %v163_v59, %v162_v51 }
  0x29   :  { %v124_v4 = vadd.f32 %v123_v61, %v122_v53  ;;  %v131_v5 = vadd.f32 %v130_v62, %v129_v54  ;;  %v138_v6 = vadd.f32 %v137_v63, %v136_v55  ;;  %v117_v11 = vadd.f32 %v116_v60, %v115_v52 }
  0x2a   :  { %v144_v7 = vrot.slane %v143_v0, 1  ;;  %v151_v8 = vrot.slane %v150_v1, 1  ;;  %v158_v9 = vrot.slane %v157_v2, 1  ;;  %v165_v10 = vrot.slane %v164_v3, 1 }
  0x2b   :  { %v175_v12 = vrot.slane %v124_v4, 7  ;;  %v176_v13 = vrot.slane %v131_v5, 6  ;;  %v177_v14 = vrot.slane %v138_v6, 5 }
  0x2c   :  { %v145_v15 = vadd.f32 %v144_v7, %v143_v0  ;;  %v152_v16 = vadd.f32 %v151_v8, %v150_v1  ;;  %v159_v17 = vadd.f32 %v158_v9, %v157_v2  ;;  %v166_v18 = vadd.f32 %v165_v10, %v164_v3 }
  0x2d   :  { %v183_v19 = vsel %vm182_vm3, %v117_v11, %v175_v12  ;;  %v185_v20 = vsel %vm184_vm4, %v176_v13, %v177_v14 }
  0x2e   :  { %v178_v21 = vrot.slane %v145_v15, 4  ;;  %v179_v22 = vrot.slane %v152_v16, 3  ;;  %v180_v23 = vrot.slane %v159_v17, 2  ;;  %v181_v24 = vrot.slane %v166_v18, 1 }
  0x2f   :  { %v186_v25 = vsel %vm110_vm2, %v183_v19, %v185_v20 }
  0x30   :  { %v188_v26 = vsel %vm187_vm5, %v178_v21, %v179_v22  ;;  %v190_v27 = vsel %vm189_vm6, %v180_v23, %v181_v24 }
  0x31   :  { %v192_v28 = vsel %vm191_vm7, %v188_v26, %v190_v27 }
  0x32   :  { %v194_v29 = vsel %vm193_vm8, %v186_v25, %v192_v28 }
  0x33   :  { %197 = vst [vmem:[#allocation7] sm:$0xff] %v194_v29 }
  0x34   :  { %337 = dma.vmem_to_hbm [thread:$0]  %s333_s1, 128, %s335_s21, [#allocation4]  }
  0x35   :  { %431 = dma.done.wait [#allocation4], 128  }
  0x36   :  { %432 = vsyncadd [#allocation4], 4294967168 }
  0x37   :  { %342 = vsyncpa [#allocation3], 1 }
  0x38   :  { %343 = vsyncpa [#allocation6], 1 }
  0x39   :  { %344 = vsyncpa [#allocation4], 1 }

</bundles_post_ra>
